<compile_context>
chip_gen: v7x
topology: tpu7x:2x2x1
jax: 0.10.0
libtpu: 0.0.40
codegen_flags: <defaults>
</compile_context>

<pallas_src>
import jax
import jax.numpy as jnp
from jax.experimental import pallas as pl
from jax.experimental.pallas import tpu as pltpu


_SUBLANE = 8      # f32 sublane granularity (batch-tile row alignment)
_MAX_TB = 1024    # max batch-tile rows; DMA-bound kernel -> fewer, bigger steps


def _round_up(x, m):
    return (x + m - 1) // m * m


def mlp_kernel(x_ref, w1_ref, b1_ref, w2_ref, b2_ref, w3_ref, b3_ref, o_ref):
    """Fused 3-layer MLP on one (tb, in_features) activation tile."""
    x = x_ref[...]

    h1 = jnp.dot(x, w1_ref[...], preferred_element_type=jnp.float32)
    h1 = jnp.maximum(h1 + b1_ref[...].astype(jnp.float32), 0.0)

    h2 = jnp.dot(h1.astype(w2_ref.dtype), w2_ref[...],
                 preferred_element_type=jnp.float32)
    h2 = jnp.maximum(h2 + b2_ref[...].astype(jnp.float32), 0.0)

    out = jnp.dot(h2.astype(w3_ref.dtype), w3_ref[...],
                  preferred_element_type=jnp.float32)
    out = out + b3_ref[...].astype(jnp.float32)

    o_ref[...] = out.astype(o_ref.dtype)


def visproprio_mlp_forward(x, w1, b1, w2, b2, w3, b3, *, tb=None):
    """y = relu(relu(x @ w1 + b1) @ w2 + b2) @ w3 + b3 via a single pallas_call.

    Weights are (in_features, out_features); biases are (1, out_features)
    (init_params produces them that way; a 1-D bias is accepted and reshaped).
    Activations are (batch, features)."""
    batch, in_size = x.shape
    hid1 = w1.shape[1]
    hid2 = w2.shape[1]
    out_size = w3.shape[1]

    # Biases should already be (1, N) so the hot path has no wrapper-side ops.
    if b1.ndim == 1:
        b1 = b1[None, :]
    if b2.ndim == 1:
        b2 = b2[None, :]
    if b3.ndim == 1:
        b3 = b3[None, :]
    assert b1.shape == (1, hid1), f"b1 shape {b1.shape} != (1, {hid1})"
    assert b2.shape == (1, hid2), f"b2 shape {b2.shape} != (1, {hid2})"
    assert b3.shape == (1, out_size), f"b3 shape {b3.shape} != (1, {out_size})"

    # ---- batch tile: sublane-aligned, two balanced tiles for v7x megacore ----
    if tb is None:
        if batch <= 8 * _SUBLANE:
            tb = _round_up(max(batch, 1), _SUBLANE)
        else:
            # Split into 2 equal tiles -> both TensorCores busy on v7x; harmless
            # extra grid step (~0.35 us) on single-TC v5e/v6e.
            tb = _round_up(pl.cdiv(batch, 2), _SUBLANE)
        tb = min(_MAX_TB, tb)
    tb = _round_up(tb, _SUBLANE)
    grid = (pl.cdiv(batch, tb),)   # unpadded grid; Pallas masks the tail block

    # ---- advisory cost estimate for the XLA scheduler ----
    def _nbytes(a):
        return int(a.size) * jnp.dtype(a.dtype).itemsize

    flops = 2 * batch * (in_size * hid1 + hid1 * hid2 + hid2 * out_size)
    bytes_accessed = (_nbytes(x)
                      + batch * out_size * jnp.dtype(x.dtype).itemsize
                      + sum(_nbytes(p) for p in (w1, b1, w2, b2, w3, b3)))

    return pl.pallas_call(
        mlp_kernel,
        out_shape=jax.ShapeDtypeStruct((batch, out_size), x.dtype),
        grid=grid,
        in_specs=[
            pl.BlockSpec((tb, in_size), lambda i: (i, 0)),   # activation tile
            pl.BlockSpec(w1.shape, lambda i: (0, 0)),        # params stay
            pl.BlockSpec(b1.shape, lambda i: (0, 0)),        # VMEM-resident
            pl.BlockSpec(w2.shape, lambda i: (0, 0)),
            pl.BlockSpec(b2.shape, lambda i: (0, 0)),
            pl.BlockSpec(w3.shape, lambda i: (0, 0)),
            pl.BlockSpec(b3.shape, lambda i: (0, 0)),
        ],
        out_specs=pl.BlockSpec((tb, out_size), lambda i: (i, 0)),
        compiler_params=pltpu.CompilerParams(
            dimension_semantics=("parallel",)),
        cost_estimate=pl.CostEstimate(
            flops=flops, transcendentals=0, bytes_accessed=bytes_accessed),
    )(x, w1, b1, w2, b2, w3, b3)


def init_params(key, input_size, hidden_size_1, hidden_size_2, output_size,
                dtype=jnp.float32):
    """Deterministic PyTorch-Linear-style init; biases come pre-shaped (1, N)
    so the forward wrapper never has to pad or reshape parameters per call."""
    ks = jax.random.split(key, 6)

    def linear_init(kw, kb, fan_in, fan_out):
        bound = 1.0 / jnp.sqrt(jnp.asarray(fan_in, dtype=jnp.float32))
        w = jax.random.uniform(kw, (fan_in, fan_out), dtype, -bound, bound)
        b = jax.random.uniform(kb, (1, fan_out), dtype, -bound, bound)
        return w, b

    w1, b1 = linear_init(ks[0], ks[1], input_size, hidden_size_1)
    w2, b2 = linear_init(ks[2], ks[3], hidden_size_1, hidden_size_2)
    w3, b3 = linear_init(ks[4], ks[5], hidden_size_2, output_size)
    return w1, b1, w2, b2, w3, b3


def _reference(x, w1, b1, w2, b2, w3, b3):
    h = jnp.maximum(x @ w1 + b1.reshape(1, -1), 0.0)
    h = jnp.maximum(h @ w2 + b2.reshape(1, -1), 0.0)
    return h @ w3 + b3.reshape(1, -1)


if __name__ == "__main__":
    # exp = {'encoding_size': 32, 'regressor_hidden_size_1': 64,
    #        'regressor_hidden_size_2': 32, 'output_size': 8}
    input_size = 32
    hidden_size_1 = 64
    hidden_size_2 = 32
    output_size = 8

    key = jax.random.PRNGKey(0)
    k_x, k_x2, k_x3, k_p = jax.random.split(key, 4)

    params = init_params(k_p, input_size, hidden_size_1, hidden_size_2,
                         output_size)

    # --- small batch (single partial grid step, tail rows masked) ---
    batch = 2
    x = jax.random.normal(k_x, (batch, input_size), dtype=jnp.float32)
    out = jax.block_until_ready(visproprio_mlp_forward(x, *params))
    ref = _reference(x, *params)
    assert out.shape == (batch, output_size)
    assert jnp.allclose(out, ref, atol=1e-5, rtol=1e-5)

    # --- large batch (two balanced tiles, unpadded grid with masked tail) ---
    big_batch = 1000
    xb = jax.random.normal(k_x2, (big_batch, input_size), dtype=jnp.float32)
    out_b = jax.block_until_ready(visproprio_mlp_forward(xb, *params))
    ref_b = _reference(xb, *params)
    assert out_b.shape == (big_batch, output_size)
    assert jnp.allclose(out_b, ref_b, atol=1e-4, rtol=1e-4)

    # --- exact-multiple batch (no tail masking, two full tiles) ---
    mid_batch = 256
    xc = jax.random.normal(k_x3, (mid_batch, input_size), dtype=jnp.float32)
    out_c = jax.block_until_ready(visproprio_mlp_forward(xc, *params))
    ref_c = _reference(xc, *params)
    assert out_c.shape == (mid_batch, output_size)
    assert jnp.allclose(out_c, ref_c, atol=1e-4, rtol=1e-4)

    print("KERNEL_OK")
</pallas_src>

<mosaic_0001>
module attributes {stable_mosaic.version = 11 : i64} {
  func.func @mlp_kernel(%arg0: i32, %arg1: memref<8x32xf32, #tpu.memory_space<vmem>>, %arg2: memref<32x64xf32, #tpu.memory_space<vmem>>, %arg3: memref<1x64xf32, #tpu.memory_space<vmem>>, %arg4: memref<64x32xf32, #tpu.memory_space<vmem>>, %arg5: memref<1x32xf32, #tpu.memory_space<vmem>>, %arg6: memref<32x8xf32, #tpu.memory_space<vmem>>, %arg7: memref<1x8xf32, #tpu.memory_space<vmem>>, %arg8: memref<8x8xf32, #tpu.memory_space<vmem>>) attributes {dimension_semantics = [#tpu.dimension_semantics<parallel>], iteration_bounds = array<i64: 1>, scalar_prefetch = 0 : i64, scratch_operands = 0 : i64, tpu.core_type = #tpu.core_type<tc>, window_params = [{transform_indices = @transform_0, window_bounds = array<i64: 8, 32>}, {pipeline_mode = #tpu.pipeline_mode<synchronous>, transform_indices = @transform_1, window_bounds = array<i64: 32, 64>}, {pipeline_mode = #tpu.pipeline_mode<synchronous>, transform_indices = @transform_2, window_bounds = array<i64: 1, 64>}, {pipeline_mode = #tpu.pipeline_mode<synchronous>, transform_indices = @transform_3, window_bounds = array<i64: 64, 32>}, {pipeline_mode = #tpu.pipeline_mode<synchronous>, transform_indices = @transform_4, window_bounds = array<i64: 1, 32>}, {pipeline_mode = #tpu.pipeline_mode<synchronous>, transform_indices = @transform_5, window_bounds = array<i64: 32, 8>}, {pipeline_mode = #tpu.pipeline_mode<synchronous>, transform_indices = @transform_6, window_bounds = array<i64: 1, 8>}, {transform_indices = @transform_7, window_bounds = array<i64: 8, 8>}]} {
    %c0 = arith.constant 0 : index
    %c0_0 = arith.constant 0 : index
    %0 = vector.load %arg1[%c0, %c0_0] : memref<8x32xf32, #tpu.memory_space<vmem>>, vector<8x32xf32>
    %c0_1 = arith.constant 0 : index
    %c0_2 = arith.constant 0 : index
    %1 = vector.load %arg2[%c0_1, %c0_2] : memref<32x64xf32, #tpu.memory_space<vmem>>, vector<32x64xf32>
    %cst = arith.constant dense<0.000000e+00> : vector<8x64xf32>
    %2 = tpu.matmul %0, %1, %cst {dimension_numbers = #tpu.dot_dimension_numbers<[1], [0], [0], [1], [0, 0, 1, 1], [], []>} : vector<8x32xf32>, vector<32x64xf32>, vector<8x64xf32> -> vector<8x64xf32>
    %c0_3 = arith.constant 0 : index
    %c0_4 = arith.constant 0 : index
    %3 = vector.load %arg3[%c0_3, %c0_4] : memref<1x64xf32, #tpu.memory_space<vmem>>, vector<1x64xf32>
    %4 = vector.broadcast %3 : vector<1x64xf32> to vector<8x64xf32>
    %5 = arith.addf %2, %4 : vector<8x64xf32>
    %cst_5 = arith.constant 0.000000e+00 : f32
    %6 = vector.broadcast %cst_5 : f32 to vector<8x64xf32>
    %7 = arith.maximumf %5, %6 : vector<8x64xf32>
    %c0_6 = arith.constant 0 : index
    %c0_7 = arith.constant 0 : index
    %8 = vector.load %arg4[%c0_6, %c0_7] : memref<64x32xf32, #tpu.memory_space<vmem>>, vector<64x32xf32>
    %cst_8 = arith.constant dense<0.000000e+00> : vector<8x32xf32>
    %9 = tpu.matmul %7, %8, %cst_8 {dimension_numbers = #tpu.dot_dimension_numbers<[1], [0], [0], [1], [0, 0, 1, 1], [], []>} : vector<8x64xf32>, vector<64x32xf32>, vector<8x32xf32> -> vector<8x32xf32>
    %c0_9 = arith.constant 0 : index
    %c0_10 = arith.constant 0 : index
    %10 = vector.load %arg5[%c0_9, %c0_10] : memref<1x32xf32, #tpu.memory_space<vmem>>, vector<1x32xf32>
    %11 = vector.broadcast %10 : vector<1x32xf32> to vector<8x32xf32>
    %12 = arith.addf %9, %11 : vector<8x32xf32>
    %cst_11 = arith.constant 0.000000e+00 : f32
    %13 = vector.broadcast %cst_11 : f32 to vector<8x32xf32>
    %14 = arith.maximumf %12, %13 : vector<8x32xf32>
    %c0_12 = arith.constant 0 : index
    %c0_13 = arith.constant 0 : index
    %15 = vector.load %arg6[%c0_12, %c0_13] : memref<32x8xf32, #tpu.memory_space<vmem>>, vector<32x8xf32>
    %cst_14 = arith.constant dense<0.000000e+00> : vector<8x8xf32>
    %16 = tpu.matmul %14, %15, %cst_14 {dimension_numbers = #tpu.dot_dimension_numbers<[1], [0], [0], [1], [0, 0, 1, 1], [], []>} : vector<8x32xf32>, vector<32x8xf32>, vector<8x8xf32> -> vector<8x8xf32>
    %c0_15 = arith.constant 0 : index
    %c0_16 = arith.constant 0 : index
    %17 = vector.load %arg7[%c0_15, %c0_16] : memref<1x8xf32, #tpu.memory_space<vmem>>, vector<1x8xf32>
    %18 = vector.broadcast %17 : vector<1x8xf32> to vector<8x8xf32>
    %19 = arith.addf %16, %18 : vector<8x8xf32>
    %c0_17 = arith.constant 0 : index
    %c0_18 = arith.constant 0 : index
    %20 = vector.load %arg8[%c0_17, %c0_18] : memref<8x8xf32, #tpu.memory_space<vmem>>, vector<8x8xf32>
    tpu.vector_store %arg8[%c0_17, %c0_18], %19 {strides = array<i32>} : memref<8x8xf32, #tpu.memory_space<vmem>>, vector<8x8xf32>,
    return
  }
  func.func @transform_0(%arg0: i32) -> (i32, i32) {
    %c0_i32 = arith.constant 0 : i32
    %c0_i32_0 = arith.constant 0 : i32
    return %arg0, %c0_i32 : i32, i32
  }
  func.func @transform_1(%arg0: i32) -> (i32, i32) {
    %c0_i32 = arith.constant 0 : i32
    %c0_i32_0 = arith.constant 0 : i32
    %c0_i32_1 = arith.constant 0 : i32
    return %c0_i32, %c0_i32_0 : i32, i32
  }
  func.func @transform_2(%arg0: i32) -> (i32, i32) {
    %c0_i32 = arith.constant 0 : i32
    %c0_i32_0 = arith.constant 0 : i32
    %c0_i32_1 = arith.constant 0 : i32
    return %c0_i32, %c0_i32_0 : i32, i32
  }
  func.func @transform_3(%arg0: i32) -> (i32, i32) {
    %c0_i32 = arith.constant 0 : i32
    %c0_i32_0 = arith.constant 0 : i32
    %c0_i32_1 = arith.constant 0 : i32
    return %c0_i32, %c0_i32_0 : i32, i32
  }
  func.func @transform_4(%arg0: i32) -> (i32, i32) {
    %c0_i32 = arith.constant 0 : i32
    %c0_i32_0 = arith.constant 0 : i32
    %c0_i32_1 = arith.constant 0 : i32
    return %c0_i32, %c0_i32_0 : i32, i32
  }
  func.func @transform_5(%arg0: i32) -> (i32, i32) {
    %c0_i32 = arith.constant 0 : i32
    %c0_i32_0 = arith.constant 0 : i32
    %c0_i32_1 = arith.constant 0 : i32
    return %c0_i32, %c0_i32_0 : i32, i32
  }
  func.func @transform_6(%arg0: i32) -> (i32, i32) {
    %c0_i32 = arith.constant 0 : i32
    %c0_i32_0 = arith.constant 0 : i32
    %c0_i32_1 = arith.constant 0 : i32
    return %c0_i32, %c0_i32_0 : i32, i32
  }
  func.func @transform_7(%arg0: i32) -> (i32, i32) {
    %c0_i32 = arith.constant 0 : i32
    %c0_i32_0 = arith.constant 0 : i32
    return %arg0, %c0_i32 : i32, i32
  }
}

</mosaic_0001>

<bundles_post_ra>
// kernel: tpu_custom_call.1
= control target key start
LH: loop header
LB: loop body
LE: loop exit
PB: predicated region body
PF: predicated region fallthrough
CT: control target
= control target key end

     0   :  { %12 = vsyncpa [#allocation3], 0  ;;  %v426_v2 = vmov 0.0|0.0   ;;  %vm427_vm0 = vmmov 0   ;;  %v428_v6 = vmov 0.0   ;;  %vm39_vm1 = vcmask 261120   ;;  %s549_s0 = inlined_call_operand.vmem [shape: f32[2,32], index: 0, kind: input, shape index: {}]   ;;  %s550_s1 = inlined_call_operand.vmem [shape: f32[32,64], index: 1, kind: input, shape index: {}]   ;;  %s551_s2 = inlined_call_operand.vmem [shape: f32[1,64], index: 2, kind: input, shape index: {}]   ;;  %s552_s3 = inlined_call_operand.vmem [shape: f32[64,32], index: 3, kind: input, shape index: {}]   ;;  %s553_s4 = inlined_call_operand.vmem [shape: f32[1,32], index: 4, kind: input, shape index: {}]   ;;  %s554_s5 = inlined_call_operand.vmem [shape: f32[32,8], index: 5, kind: input, shape index: {}]   ;;  %s555_s6 = inlined_call_operand.vmem [shape: f32[1,8], index: 6, kind: input, shape index: {}]   ;;  %s556_s7 = inlined_call_operand.hbm [shape: f32[2,8], index: 7, kind: output, shape index: {}]  }
   0x1   :  { %v28_v0 = vld [vmem:[%s550_s1] sm:$0xff]  ;;  %v29_v1 = vld [vmem:[%s550_s1 + $0x8] sm:$0xff]  ;;  %372 = vmatprep.subr.bf16.mxu0 %v426_v2  ;;  %v30_v4 = vld [vmem:[%s550_s1 + $0x10] sm:$0xff]  ;;  %378 = vmatprep.subr.bf16.mxu1 %v426_v2  ;;  %vm129_vm2 = vcmask 523264   ;;  %vm288_vm3 = vcmask 64512  }
   0x2   :  { %v373_v3 = vpack.c.bf16 %v29_v1, %v28_v0  ;;  %v31_v5 = vld [vmem:[%s550_s1 + $0x18] sm:$0xff]  ;;  %339 = vmatprep.mubr.msk.f32.mxu0 %vm427_vm0, %v428_v6  ;;  %v114_v7 = vld [vmem:[%s552_s3] sm:$0xff]  ;;  %v115_v8 = vld [vmem:[%s552_s3 + $0x8] sm:$0xff]  ;;  %358 = vmatprep.mubr.msk.f32.mxu1 %vm427_vm0, %v428_v6 }
   0x3   :  { %v116_v9 = vld [vmem:[%s552_s3 + $0x10] sm:$0xff]  ;;  %v376_v10 = vpack.c.bf16 %v31_v5, %v30_v4  ;;  %v379_v11 = vpack.c.bf16 %v115_v8, %v114_v7  ;;  %v117_v12 = vld [vmem:[%s552_s3 + $0x18] sm:$0xff]  ;;  %v118_v14 = vld [vmem:[%s552_s3 + $0x20] sm:$0xff] }
   0x4   :  { %374 = vmatpush3.bf16.msra.mxu0 %v373_v3  ;;  %v382_v13 = vpack.c.bf16 %v117_v12, %v116_v9  ;;  %v119_v15 = vld [vmem:[%s552_s3 + $0x28] sm:$0xff]  ;;  %v27_v16 = vld [vmem:[%s549_s0] sm:$0xff]  ;;  %v120_v18 = vld [vmem:[%s552_s3 + $0x30] sm:$0xff] }
   0x5   :  { %375 = vmatprep.subr.bf16.mxu0 %v426_v2  ;;  %380 = vmatpush3.bf16.msra.mxu1 %v379_v11  ;;  %v385_v17 = vpack.c.bf16 %v119_v15, %v118_v14  ;;  %v121_v19 = vld [vmem:[%s552_s3 + $0x38] sm:$0xff]  ;;  %v204_v21 = vld [vmem:[%s554_s5] sm:$0xff]  ;;  %v205_v22 = vld [vmem:[%s554_s5 + $0x8] sm:$0xff] }
   0x6   :  { %381 = vmatprep.subr.bf16.mxu1 %v426_v2  ;;  %v388_v20 = vpack.c.bf16 %v121_v19, %v120_v18  ;;  %v391_v23 = vpack.c.bf16 %v205_v22, %v204_v21  ;;  %v306_v24 = vld [vmem:[%s551_s2] ss:$0 sm:$0xff]  ;;  %v206_v29 = vld [vmem:[%s554_s5 + $0x10] sm:$0xff]  ;;  %v207_v30 = vld [vmem:[%s554_s5 + $0x18] sm:$0xff] }
   0x7   :  { %v394_v31 = vpack.c.bf16 %v207_v30, %v206_v29  ;;  %v308_v32 = vld [vmem:[%s553_s4] ss:$0 sm:$0xff] }
   0x8   :  { %377 = vmatpush3.bf16.msra.mxu0 %v376_v10  ;;  %v310_v37 = vld [vmem:[%s555_s6] ss:$0 sm:$0xff] }
   0x9   :  { %390 = vmatprep.subr.bf16.mxu0 %v426_v2  ;;  %383 = vmatpush3.bf16.msra.mxu1 %v382_v13 }
   0xa   :  { %384 = vmatprep.subr.bf16.mxu1 %v426_v2 }
   0xb   :  { %340 = vmatmul.mubr.msk.f32.vlgmr.msra.gmra.mrb[0].mxu0 %vm39_vm1, %v27_v16 }
   0xc   :  { %369 = vmatprep.mubr.msk.f32.mxu0 %vm427_vm0, %v428_v6  ;;  %392 = vmatpush3.bf16.msra.mxu0 %v391_v23 }
   0xd   :  { %386 = vmatpush3.bf16.msra.mxu1 %v385_v17  ;;  %393 = vmatprep.subr.bf16.mxu0 %v426_v2 }
   0xe   :  { %387 = vmatprep.subr.bf16.mxu1 %v426_v2 }
  0x10   :  { %395 = vmatpush3.bf16.msra.mxu0 %v394_v31 }
  0x11   :  { %389 = vmatpush3.bf16.msra.mxu1 %v388_v20 }
  0xde   :  { %v109_v25 = vpop.f32.mrb[0].mxu0 }
  0xdf   :  { %v110_v26 = vadd.f32 %v306_v24, %v109_v25  ;;  %v341_v27 = vpop.f32.mrb[1].mxu0 }
  0xe1   :  { %v113_v28 = vmax.f32 %v110_v26, 0.0 }
  0xe3   :  { %359 = vmatmul.mubr.msk.f32.vlgmr.msra.gmra.mrb[0].mxu1 %vm129_vm2, %v113_v28 }
 0x1b6   :  { %v199_v33 = vpop.f32.mrb[0].mxu1 }
 0x1b7   :  { %v200_v34 = vadd.f32 %v308_v32, %v199_v33  ;;  %v360_v35 = vpop.f32.mrb[1].mxu1 }
 0x1b9   :  { %v203_v36 = vmax.f32 %v200_v34, 0.0 }
 0x1bb   :  { %370 = vmatmul.mubr.msk.f32.vlgmr.msra.gmra.mrb[2].mxu0 %vm39_vm1, %v203_v36 }
 0x28e   :  { %v284_v38 = vpop.f32.mrb[2].mxu0 }
 0x28f   :  { %v285_v39 = vadd.f32 %v310_v37, %v284_v38  ;;  %v371_v40 = vpop.f32.mrb[3].mxu0 }
 0x291   :  { %289 = vst.msk [vmem:[#allocation2] sm:$0xff] %vm288_vm3, %v285_v39 }
 0x292   :  { %294 = vsyncadd [#allocation3], 96  ;;  %s429_s5 = smov [#allocation2]  }
 0x293   :  { %s295_s14 = sshll.u32 %s429_s5, 4  ;;  %s296_s14 = int_to_ptr.vmem [resolvable:$true] %s295_s14 }
 0x294   :  { %s402_s4 = scalar_lea.vmem %s296_s14, 32  ;;  %s406_s1 = scalar_lea.vmem %s296_s14, 128 }
 0x295   :  { %p403_p0 = scmp.ne.s32.totalorder %s296_s14, %s402_s4  ;;  %p407_p1 = scmp.lt.s32.totalorder %s296_s14, %s296_s14 }
 0x296   :  { %p408_p2 = scmp.lt.s32.totalorder %s406_s1, %s402_s4 }
 0x298   :  { %p409_p3 = por %p408_p2, %p407_p1 }
 0x29a   :  { %p410_p4 = pnand %p409_p3, %p403_p0 }
 0x29c   :  { %413 = shalt.err (!%p410_p4)
}
 0x29d   :  { %s414_s6 = scalar_lea.hbm %s556_s7, 32 }
 0x29e   :  { %p415_p5 = scmp.ne.s32.totalorder %s556_s7, %s414_s6  ;;  %p418_p6 = scmp.lt.u32.totalorder %s414_s6, %s556_s7 }
 0x2a0   :  { %p420_p7 = pnand %p418_p6, %p415_p5 }
 0x2a2   :  { %423 = shalt.err (!%p420_p7)
}
 0x2a3   :  { %s430_s21 = smov 32   ;;  %s431_s22 = smov 2  }
 0x2a4   :  { %301 = dma.vmem_to_hbm [thread:$0]  %s296_s14, 32, %s556_s7, [#allocation3], %s430_s21, %s430_s21, %s431_s22  }
 0x2a5   :  { %424 = dma.done.wait [#allocation3], 128  }
 0x2a6   :  { %425 = vsyncadd [#allocation3], 4294967168 }
 0x2a7   :  { %305 = vsyncpa [#allocation3], 1 }

</bundles_post_ra>
